<compile_context>
chip_gen: v5e
topology: v5e:2x2
jax: 0.10.0
libtpu: 0.0.40
codegen_flags: <defaults>
</compile_context>

<pallas_src>
import jax
import jax.numpy as jnp
from jax.experimental import pallas as pl
from jax.experimental.pallas import tpu as pltpu


def _parallel_table_kernel(vids_ref, rids_ref, img_ref, verb_tab_ref, role_tab_ref,
                           out_ref):
    # vids_ref:     VMEM (TB, 1)   int32  verb id per batch row of this tile
    # rids_ref:     VMEM (TB*R, 1) int32  role id per output row of this tile
    # img_ref:      VMEM (TB, E)          image embeddings for this tile
    # verb_tab_ref: VMEM (NV, E)          full verb table, VMEM-resident
    # role_tab_ref: VMEM (NR, E)          full role table (padding row all-zero)
    # out_ref:      VMEM (TB*R, E)        dense output slab for this tile
    f32 = jnp.float32
    tb, _ = img_ref.shape
    tbr, _ = out_ref.shape
    roles = tbr // tb                       # R, static
    nv = verb_tab_ref.shape[0]
    nr = role_tab_ref.shape[0]

    # --- verb rows: one_hot(ids) @ table on the (otherwise idle) MXU ---------
    vids = vids_ref[...]                                              # (TB, 1)
    v_oh = (jax.lax.broadcasted_iota(jnp.int32, (tb, nv), 1) == vids).astype(f32)
    verb_rows = jnp.dot(v_oh, verb_tab_ref[...].astype(f32),
                        preferred_element_type=f32)                   # (TB, E)

    # image x verb hoisted to once per batch row (1 extra mul/elem, not R)
    img_verb = img_ref[...].astype(f32) * verb_rows                   # (TB, E)

    # --- replicate each batch row R times via a constant one-hot matmul ------
    # rep[i, j] = 1 iff j == i // R, built from iotas + compares (no int div,
    # no sublane broadcast+reshape relayout).
    row = jax.lax.broadcasted_iota(jnp.int32, (tbr, tb), 0)
    col = jax.lax.broadcasted_iota(jnp.int32, (tbr, tb), 1)
    rep = ((row >= col * roles) & (row < col * roles + roles)).astype(f32)
    img_verb_rep = jnp.dot(rep, img_verb, preferred_element_type=f32)  # (TBR, E)

    # --- role rows: one_hot(ids) @ table --------------------------------------
    rids = rids_ref[...]                                              # (TBR, 1)
    r_oh = (jax.lax.broadcasted_iota(jnp.int32, (tbr, nr), 1) == rids).astype(f32)
    role_rows = jnp.dot(r_oh, role_tab_ref[...].astype(f32),
                        preferred_element_type=f32)                   # (TBR, E)

    # single sublane- and lane-dense store of the whole tile (f32 math, one cast)
    out_ref[...] = (img_verb_rep * role_rows).astype(out_ref.dtype)


def parallel_table_forward(image_embed, verb_ids, role_ids, verb_table, role_table,
                           *, tile_batch=8):
    B, E = image_embed.shape
    R = role_ids.shape[1]
    nv = verb_table.shape[0]
    nr = role_table.shape[0]
    out_dtype = image_embed.dtype

    tb = min(tile_batch, B)
    num_tiles = pl.cdiv(B, tb)
    bp = num_tiles * tb
    if bp != B:                              # pad so every tile is full/aligned
        pad = bp - B
        image_embed = jnp.pad(image_embed, ((0, pad), (0, 0)))
        verb_ids = jnp.pad(verb_ids, ((0, pad),))
        role_ids = jnp.pad(role_ids, ((0, pad), (0, 0)))

    tbr = tb * R
    vids = verb_ids.astype(jnp.int32).reshape(bp, 1)
    rids = role_ids.astype(jnp.int32).reshape(bp * R, 1)

    # Size the VMEM limit from the actual re-tiled footprint (double-buffered
    # tile blocks + resident tables), with generous headroom, capped for v7x.
    isz = 4
    tile_bytes = 2 * isz * (tb * E + tbr * E + tb * 128 + tbr * 128)
    table_bytes = 2 * isz * (nv + nr) * max(E, 128)
    vmem_limit = int(min(48 * 1024 * 1024,
                         max(8 * 1024 * 1024, 4 * (tile_bytes + table_bytes))))

    grid_spec = pltpu.PrefetchScalarGridSpec(
        num_scalar_prefetch=0,
        grid=(num_tiles,),                   # >=2 steps so v7x's 2 TCs both work
        in_specs=[
            pl.BlockSpec((tb, 1), lambda t: (t, 0)),      # verb ids (VMEM int32)
            pl.BlockSpec((tbr, 1), lambda t: (t, 0)),     # role ids (VMEM int32)
            pl.BlockSpec((tb, E), lambda t: (t, 0)),      # image tile
            # full tables with constant block index -> DMA'd once, VMEM-resident
            pl.BlockSpec((nv, E), lambda t: (0, 0)),
            pl.BlockSpec((nr, E), lambda t: (0, 0)),
        ],
        out_specs=pl.BlockSpec((tbr, E), lambda t: (t, 0)),
    )

    out2d = pl.pallas_call(
        _parallel_table_kernel,
        out_shape=jax.ShapeDtypeStruct((bp * R, E), out_dtype),
        grid_spec=grid_spec,
        compiler_params=pltpu.CompilerParams(
            dimension_semantics=("parallel",),
            vmem_limit_bytes=vmem_limit,
        ),
    )(vids, rids, image_embed, verb_table, role_table)

    return out2d[: B * R].reshape(B, R, E)


if __name__ == "__main__":
    # Small shapes consistent with the module's forward:
    #   x[0]: image embed (B, E), x[1]: verb ids (B,), x[2]: role ids (B, R)
    B, R, E = 16, 6, 128
    num_verbs, num_roles = 10, 7

    key = jax.random.PRNGKey(0)
    k_img, k_verb, k_role, k_vid, k_rid = jax.random.split(key, 5)

    image_embed = jax.random.normal(k_img, (B, E), dtype=jnp.float32)

    # nn.Embedding default init ~ N(0, 1); padding_idx row is zero.
    verb_table = jax.random.normal(k_verb, (num_verbs, E), dtype=jnp.float32)
    role_table = jax.random.normal(k_role, (num_roles + 1, E), dtype=jnp.float32)
    role_table = role_table.at[num_roles].set(0.0)      # padding_idx = num_roles

    verb_ids = jax.random.randint(k_vid, (B,), 0, num_verbs, dtype=jnp.int32)
    role_ids = jax.random.randint(k_rid, (B, R), 0, num_roles, dtype=jnp.int32)
    role_ids = role_ids.at[0, R - 1].set(num_roles)      # exercise padding row

    out = parallel_table_forward(image_embed, verb_ids, role_ids,
                                 verb_table, role_table)
    out = jax.block_until_ready(out)

    # Pure-JAX reference of the PyTorch forward.
    verb_embed = verb_table[verb_ids]                    # (B, E)
    role_embed = role_table[role_ids]                    # (B, R, E)
    ref = image_embed[:, None, :] * verb_embed[:, None, :] * role_embed

    assert out.shape == (B, R, E)
    assert out.dtype == jnp.float32
    assert jnp.allclose(out, ref, atol=1e-5, rtol=1e-5)
    print("KERNEL_OK")
</pallas_src>

<mosaic_0001>
module attributes {stable_mosaic.version = 11 : i64} {
  func.func @_parallel_table_kernel(%arg0: i32, %arg1: memref<8x1xi32, #tpu.memory_space<vmem>>, %arg2: memref<48x1xi32, #tpu.memory_space<vmem>>, %arg3: memref<8x128xf32, #tpu.memory_space<vmem>>, %arg4: memref<10x128xf32, #tpu.memory_space<vmem>>, %arg5: memref<8x128xf32, #tpu.memory_space<vmem>>, %arg6: memref<48x128xf32, #tpu.memory_space<vmem>>) attributes {dimension_semantics = [#tpu.dimension_semantics<parallel>], iteration_bounds = array<i64: 2>, scalar_prefetch = 0 : i64, scratch_operands = 0 : i64, tpu.core_type = #tpu.core_type<tc>, window_params = [{transform_indices = @transform_0, window_bounds = array<i64: 8, 1>}, {transform_indices = @transform_1, window_bounds = array<i64: 48, 1>}, {transform_indices = @transform_2, window_bounds = array<i64: 8, 128>}, {pipeline_mode = #tpu.pipeline_mode<synchronous>, transform_indices = @transform_3, window_bounds = array<i64: 10, 128>}, {pipeline_mode = #tpu.pipeline_mode<synchronous>, transform_indices = @transform_4, window_bounds = array<i64: 8, 128>}, {transform_indices = @transform_5, window_bounds = array<i64: 48, 128>}]} {
    %c0 = arith.constant 0 : index
    %c0_0 = arith.constant 0 : index
    %0 = vector.load %arg1[%c0, %c0_0] : memref<8x1xi32, #tpu.memory_space<vmem>>, vector<8x1xi32>
    %1 = tpu.iota {dimensions = array<i32: 1>} : vector<8x10xi32>
    %2 = vector.broadcast %0 : vector<8x1xi32> to vector<8x10xi32>
    %3 = arith.cmpi eq, %1, %2 : vector<8x10xi32>
    %4 = arith.extui %3 : vector<8x10xi1> to vector<8x10xi32>
    %5 = arith.sitofp %4 : vector<8x10xi32> to vector<8x10xf32>
    %c0_1 = arith.constant 0 : index
    %c0_2 = arith.constant 0 : index
    %6 = vector.load %arg4[%c0_1, %c0_2] : memref<10x128xf32, #tpu.memory_space<vmem>>, vector<10x128xf32>
    %cst = arith.constant dense<0.000000e+00> : vector<8x128xf32>
    %7 = tpu.matmul %5, %6, %cst {dimension_numbers = #tpu.dot_dimension_numbers<[1], [0], [0], [1], [0, 0, 1, 1], [], []>} : vector<8x10xf32>, vector<10x128xf32>, vector<8x128xf32> -> vector<8x128xf32>
    %c0_3 = arith.constant 0 : index
    %c0_4 = arith.constant 0 : index
    %8 = vector.load %arg3[%c0_3, %c0_4] : memref<8x128xf32, #tpu.memory_space<vmem>>, vector<8x128xf32>
    %9 = arith.mulf %8, %7 : vector<8x128xf32>
    %10 = tpu.iota {dimensions = array<i32: 0>} : vector<48x8xi32>
    %11 = tpu.iota {dimensions = array<i32: 1>} : vector<48x8xi32>
    %c6_i32 = arith.constant 6 : i32
    %12 = vector.broadcast %c6_i32 : i32 to vector<48x8xi32>
    %13 = arith.muli %11, %12 : vector<48x8xi32>
    %14 = arith.cmpi sge, %10, %13 : vector<48x8xi32>
    %c6_i32_5 = arith.constant 6 : i32
    %15 = vector.broadcast %c6_i32_5 : i32 to vector<48x8xi32>
    %16 = arith.muli %11, %15 : vector<48x8xi32>
    %c6_i32_6 = arith.constant 6 : i32
    %17 = vector.broadcast %c6_i32_6 : i32 to vector<48x8xi32>
    %18 = arith.addi %16, %17 : vector<48x8xi32>
    %19 = arith.cmpi slt, %10, %18 : vector<48x8xi32>
    %20 = arith.andi %14, %19 : vector<48x8xi1>
    %21 = arith.extui %20 : vector<48x8xi1> to vector<48x8xi32>
    %22 = arith.sitofp %21 : vector<48x8xi32> to vector<48x8xf32>
    %cst_7 = arith.constant dense<0.000000e+00> : vector<48x128xf32>
    %23 = tpu.matmul %22, %9, %cst_7 {dimension_numbers = #tpu.dot_dimension_numbers<[1], [0], [0], [1], [0, 0, 1, 1], [], []>} : vector<48x8xf32>, vector<8x128xf32>, vector<48x128xf32> -> vector<48x128xf32>
    %c0_8 = arith.constant 0 : index
    %c0_9 = arith.constant 0 : index
    %24 = vector.load %arg2[%c0_8, %c0_9] : memref<48x1xi32, #tpu.memory_space<vmem>>, vector<48x1xi32>
    %25 = tpu.iota {dimensions = array<i32: 1>} : vector<48x8xi32>
    %26 = vector.broadcast %24 : vector<48x1xi32> to vector<48x8xi32>
    %27 = arith.cmpi eq, %25, %26 : vector<48x8xi32>
    %28 = arith.extui %27 : vector<48x8xi1> to vector<48x8xi32>
    %29 = arith.sitofp %28 : vector<48x8xi32> to vector<48x8xf32>
    %c0_10 = arith.constant 0 : index
    %c0_11 = arith.constant 0 : index
    %30 = vector.load %arg5[%c0_10, %c0_11] : memref<8x128xf32, #tpu.memory_space<vmem>>, vector<8x128xf32>
    %cst_12 = arith.constant dense<0.000000e+00> : vector<48x128xf32>
    %31 = tpu.matmul %29, %30, %cst_12 {dimension_numbers = #tpu.dot_dimension_numbers<[1], [0], [0], [1], [0, 0, 1, 1], [], []>} : vector<48x8xf32>, vector<8x128xf32>, vector<48x128xf32> -> vector<48x128xf32>
    %32 = arith.mulf %23, %31 : vector<48x128xf32>
    %c0_13 = arith.constant 0 : index
    %c0_14 = arith.constant 0 : index
    %33 = vector.load %arg6[%c0_13, %c0_14] : memref<48x128xf32, #tpu.memory_space<vmem>>, vector<48x128xf32>
    tpu.vector_store %arg6[%c0_13, %c0_14], %32 {strides = array<i32>} : memref<48x128xf32, #tpu.memory_space<vmem>>, vector<48x128xf32>,
    return
  }
  func.func @transform_0(%arg0: i32) -> (i32, i32) {
    %c0_i32 = arith.constant 0 : i32
    %c0_i32_0 = arith.constant 0 : i32
    return %arg0, %c0_i32 : i32, i32
  }
  func.func @transform_1(%arg0: i32) -> (i32, i32) {
    %c0_i32 = arith.constant 0 : i32
    %c0_i32_0 = arith.constant 0 : i32
    return %arg0, %c0_i32 : i32, i32
  }
  func.func @transform_2(%arg0: i32) -> (i32, i32) {
    %c0_i32 = arith.constant 0 : i32
    %c0_i32_0 = arith.constant 0 : i32
    return %arg0, %c0_i32 : i32, i32
  }
  func.func @transform_3(%arg0: i32) -> (i32, i32) {
    %c0_i32 = arith.constant 0 : i32
    %c0_i32_0 = arith.constant 0 : i32
    %c0_i32_1 = arith.constant 0 : i32
    return %c0_i32, %c0_i32_0 : i32, i32
  }
  func.func @transform_4(%arg0: i32) -> (i32, i32) {
    %c0_i32 = arith.constant 0 : i32
    %c0_i32_0 = arith.constant 0 : i32
    %c0_i32_1 = arith.constant 0 : i32
    return %c0_i32, %c0_i32_0 : i32, i32
  }
  func.func @transform_5(%arg0: i32) -> (i32, i32) {
    %c0_i32 = arith.constant 0 : i32
    %c0_i32_0 = arith.constant 0 : i32
    return %arg0, %c0_i32 : i32, i32
  }
}

</mosaic_0001>

<bundles_post_ra>
// kernel: tpu_custom_call.1
= control target key start
LH: loop header
LB: loop body
LE: loop exit
PB: predicated region body
PF: predicated region fallthrough
CT: control target
= control target key end

     0   :  { %10 = vsyncpa [#allocation3], 0  ;;  %s926_s0 = inlined_call_operand.vmem [shape: s32[16,1], index: 0, kind: input, shape index: {}]   ;;  %s927_s1 = inlined_call_operand.vmem [shape: s32[96,1], index: 1, kind: input, shape index: {}]   ;;  %s928_s2 = inlined_call_operand.vmem [shape: f32[16,128], index: 2, kind: input, shape index: {}]   ;;  %s929_s3 = inlined_call_operand.vmem [shape: f32[10,128], index: 3, kind: input, shape index: {}]   ;;  %s930_s4 = inlined_call_operand.vmem [shape: f32[8,128], index: 4, kind: input, shape index: {}]   ;;  %s931_s5 = inlined_call_operand.hbm [shape: f32[96,128], index: 5, kind: output, shape index: {}]  }
   0x1   :  { %12 = vsyncpa [#allocation3 + $0x1], 0  ;;  %s789_s18 = smov 0   ;;  %s791_s19 = smov 0  }
   0x2   :  { %s793_s20 = smov 0   ;;  %s795_s21 = smov 0  }
   0x3 LB: > { %s810_s22 = sadd.s32 4294967295, %s753_s21   ;;  %s604_s23 = sadd.s32 4294967294, %s753_s21   ;;  %s753_s21 = sphi %s795_s21, %s937_s21   ;;  %s749_s20 = sphi %s793_s20, %s936_s20   ;;  %s745_s19 = sphi %s791_s19, %s935_s19   ;;  %s741_s18 = sphi %s789_s18, %s934_s18  }
   0x4   : > { %s814_s24 = sadd.s32 1, %s753_s21   ;;  %s145_s25 = sadd.s32 1, %s749_s20 }
   0x5   : > { %s142_s26 = ssub.s32 %s753_s21, %s814_s24  ;;  %p155_p0 = scmp.ne.s32.totalorder %s749_s20, %s745_s19 }
   0x6   : > { %p143_p1 = scmp.eq.s32.totalorder %s142_s26, 0  ;;  %p156_p2 = scmp.eq.s32.totalorder %s810_s22, 1 }
   0x7   : > { %p161_p3 = scmp.ne.s32.totalorder %s745_s19, %s741_s18  ;;  %p162_p4 = scmp.eq.s32.totalorder %s604_s23, 1 }
   0x8   : > { %s825_s27 = scalar_select %p143_p1, %s749_s20, %s145_s25  }
   0x9   : > { %p827_p5 = por %p156_p2, %p155_p0  ;;  %p831_p6 = por %p162_p4, %p161_p3 }
   0xa   : > { %p607_p7 = scmp.ge.s32.totalorder %s753_s21, 1  ;;  %p209_p8 = scmp.lt.s32.totalorder %s753_s21, 3 }
   0xc   : > { %p210_p9 = pnand %p607_p7, %p209_p8 }
   0xd   : > { %p245_p10 = scmp.lt.s32.totalorder (!%p210_p9), %s810_s22, 1  ;;  %s249_s30 = smul.u32 (!%p210_p9), 6, %s810_s22 }
   0xe   : > { %213 = sbr.rel (%p210_p9) target bundleno = 426 (0x1aa), region = 40 }
   0xf   : > { %p250_p11 = scmp.lt.s32.totalorder (!%p210_p9), %s249_s30, 11  ;;  %s641_s11 = smul.u32 (!%p210_p9), 48, %s810_s22 }
  0x11   : > { %s514_s14 = scalar_lea.hbm (!%p210_p9), %s931_s5, %s641_s11 }
  0x13   : > { %v270_v0 = vld [vmem:[%s929_s3 + $0x8] sm:$0x3]  ;;  %vm275_vm0 = vcmask 1041408   ;;  %v755_v1 = vmov 0   ;;  %s843_s8 = scalar_select %p245_p10, %s810_s22, 1  ;;  %v269_v6 = vld [vmem:[%s929_s3] sm:$0xff]  ;;  %v261_v11 = vlaneseq }
  0x14   : > { %688 = vset.pattern.permute.xlu0 %v755_v1  ;;  %690 = vset.pattern.permute.xlu2 %v755_v1  ;;  %s939_s30 = smov (!%p250_p11, %s249_s30), 11  ;;  %v436_v8 = vld [vmem:[%s930_s4] sm:$0xff]  ;;  %vm271_vm1 = vcmask 80896   ;;  %v756_v14 = vmov 0.0   ;;  %vm340_vm4 = vcmask 64512  }
  0x15   : > { %612 = vmatpush.msk.msra.mxu0 %vm275_vm0, %v270_v0  ;;  %689 = vset.pattern.permute.xlu1 %v755_v1  ;;  %s608_s9 = sshll.u32 %s843_s8, 3  ;;  %s609_s13 = sshll.u32 %s939_s30, 3  ;;  %v262_v12 = vand.u32 127, %v261_v11  ;;  %v302_v29 = vshrl.u32 %v261_v11, 7 }
  0x16   : > { %s248_s12 = scalar_lea.vmem %s926_s0, %s608_s9  ;;  %s253_s16 = scalar_lea.vmem %s927_s1, %s609_s13  ;;  %643 = vmatpush.msra.mxu2 %v436_v8 }
  0x17   : > { %v260_v2 = vld [vmem:[%s248_s12] sm:$0xff]  ;;  %v396_v4 = vld [vmem:[%s253_s16 + $0x10] sm:$0xff]  ;;  %v395_v5 = vld [vmem:[%s253_s16 + $0x8] sm:$0xff]  ;;  %294 = vmatpush.msra.mxu0 %v269_v6  ;;  %v308_v28 = vmul.u32 6, %v262_v12  ;;  %v306_v31 = vadd.s32 32, %v302_v29  ;;  %s258_s7 = scalar_lea.vmem %s928_s2, %s608_s9  ;;  %v303_v33 = vadd.s32 8, %v302_v29 }
  0x18   : > { %264 = vperm.xlu0 %688, %v260_v2   ;;  %v394_v3 = vld [vmem:[%s253_s16] sm:$0xff]  ;;  %v397_v7 = vld [vmem:[%s253_s16 + $0x18] sm:$0xff]  ;;  %v399_v10 = vld [vmem:[%s253_s16 + $0x28] sm:$0xff]  ;;  %v307_v34 = vadd.s32 40, %v302_v29  ;;  %v304_v39 = vadd.s32 16, %v302_v29  ;;  %v305_v42 = vadd.s32 24, %v302_v29 }
  0x19   : > { %401 = vperm.xlu2 %690, %v394_v3   ;;  %410 = vperm.xlu1 %689, %v397_v7   ;;  %v398_v9 = vld [vmem:[%s253_s16 + $0x20] sm:$0xff]  ;;  %v315_v30 = vadd.s32 6, %v308_v28  ;;  %vm309_vm10 = vcmp.ge.s32.totalorder %v302_v29, %v308_v28  ;;  %vm313_vm12 = vcmp.ge.s32.totalorder %v306_v31, %v308_v28  ;;  %vm310_vm0 = vcmp.ge.s32.totalorder %v303_v33, %v308_v28  ;;  %s242_s8 = sand.u32 1, %s745_s19   ;;  %s517_s16 = sshll.u32 %s514_s14, 4  ;;  %s518_s16 = int_to_ptr.hbm [resolvable:$true] %s517_s16 }
  0x1a   : > { %470 = vmatpush.msrb.mxu0 %v436_v8  ;;  %v299_v32 = vld [vmem:[%s258_s7] sm:$0xff]  ;;  %s644_s9 = smul.u32 48, %s242_s8  ;;  %s503_s17 = scalar_lea.sflag [#allocation3], %s242_s8 }
  0x1b   : > { %vm316_vm11 = vcmp.lt.s32.totalorder %v302_v29, %v315_v30  ;;  %vm320_vm13 = vcmp.lt.s32.totalorder %v306_v31, %v315_v30  ;;  %s705_s22 = sshra.s32 %s518_s16, 4  ;;  %s711_s30 = scalar_lea.hbm %s931_s5, 96  ;;  %s706_s22 = int_to_ptr.hbm [resolvable:$true] %s705_s22 }
  0x1c   : > { %vm322_vm14 = vmand %vm309_vm10, %vm316_vm11  ;;  %vm312_vm10 = vcmp.ge.s32.totalorder %v305_v42, %v308_v28  ;;  %vm319_vm11 = vcmp.lt.s32.totalorder %v305_v42, %v315_v30  ;;  %s244_s10 = scalar_lea.vmem [#allocation2], %s644_s9  ;;  %s707_s23 = scalar_lea.hbm %s706_s22, 48 }
  0x1d   : > { %vm326_vm15 = vmand %vm313_vm12, %vm320_vm13  ;;  %v614_v37 = vsel %vm322_vm14, 1.0, %v756_v14  ;;  %s515_s15 = sshll.u32 %s244_s10, 4  ;;  %p708_p12 = scmp.ne.s32.totalorder %s706_s22, %s707_s23  ;;  %s516_s15 = int_to_ptr.vmem [resolvable:$true] %s515_s15 }
  0x1e   : > { %v618_v38 = vsel %vm326_vm15, 1.0, %v756_v14  ;;  %vm325_vm12 = vmand %vm312_vm10, %vm319_vm11  ;;  %p712_p1 = scmp.lt.s32.totalorder %s706_s22, %s931_s5  ;;  %p713_p2 = scmp.lt.s32.totalorder %s711_s30, %s707_s23 }
  0x1f   : > { %v617_v44 = vsel %vm325_vm12, 1.0, %v756_v14  ;;  %p709_p13 = pnand %p708_p12, %p827_p5 }
  0x20   : > { %407 = vperm.xlu0 %688, %v396_v4   ;;  %p714_p3 = por %p713_p2, %p712_p1 }
  0x21   : > { %413 = vperm.xlu1 %689, %v398_v9   ;;  %416 = vperm.xlu2 %690, %v399_v10   ;;  %p710_p0 = pneg %p709_p13 }
  0x23   : > { %p715_p4 = pnand %p714_p3, %p710_p0 }
  0x28   : > { %404 = vperm.xlu0 %688, %v395_v5  }
  0x73   : > { %v402_v16 = vpop.permute.xlu2 %401 }
  0x74   : > { %vm418_vm3 = vcmp.eq.s32.totalorder %v262_v12, %v402_v16 }
  0x75   : > { %v626_v17 = vsel %vm418_vm3, 1.0, %v756_v14  ;;  %vm321_vm3 = vcmp.lt.s32.totalorder %v307_v34, %v315_v30 }
  0x7b   : > { %v417_v26 = vpop.permute.xlu2 %416 }
  0x7c   : > { %vm423_vm9 = vcmp.eq.s32.totalorder %v262_v12, %v417_v26 }
  0x7d   : > { %v631_v27 = vsel %vm423_vm9, 1.0, %v756_v14 }
  0x8a   : > { %v265_v13 = vpop.permute.xlu0 %264 }
  0x8b   : > { %vm266_vm2 = vcmp.eq.s32.totalorder %v262_v12, %v265_v13  ;;  %v411_v22 = vpop.permute.xlu1 %410 }
  0x8c   : > { %v611_v15 = vsel %vm266_vm2, 1.0, %v756_v14  ;;  %vm421_vm7 = vcmp.eq.s32.totalorder %v262_v12, %v411_v22  ;;  %vm314_vm2 = vcmp.ge.s32.totalorder %v307_v34, %v308_v28 }
  0x8d   : > { %613 = vmatmul.msk.f32.vlgmr.msra.gmra.mxu0 %vm271_vm1, %v611_v15  ;;  %v629_v23 = vsel %vm421_vm7, 1.0, %v756_v14  ;;  %vm317_vm1 = vcmp.lt.s32.totalorder %v303_v33, %v315_v30  ;;  %vm311_vm7 = vcmp.ge.s32.totalorder %v304_v39, %v308_v28 }
  0x92   : > { %v408_v18 = vpop.permute.xlu0 %407 }
  0x93   : > { %vm420_vm5 = vcmp.eq.s32.totalorder %v262_v12, %v408_v18  ;;  %v414_v24 = vpop.permute.xlu1 %413 }
  0x94   : > { %v628_v19 = vsel %vm420_vm5, 1.0, %v756_v14  ;;  %vm422_vm8 = vcmp.eq.s32.totalorder %v262_v12, %v414_v24  ;;  %vm323_vm5 = vmand %vm310_vm0, %vm317_vm1 }
  0x95   : > { %632 = vmatmul.msk.f32.vlgmr.msrb.gmra.mxu0 %vm340_vm4, %v626_v17  ;;  %634 = vmatmul.msk.f32.vlgmr.msra.gmra.mxu2 %vm340_vm4, %v628_v19  ;;  %v630_v25 = vsel %vm422_vm8, 1.0, %v756_v14  ;;  %v615_v40 = vsel %vm323_vm5, 1.0, %v756_v14  ;;  %vm318_vm8 = vcmp.lt.s32.totalorder %v304_v39, %v315_v30 }
  0x96   : > { %vm324_vm9 = vmand %vm311_vm7, %vm318_vm8 }
  0x97   : > { %v616_v43 = vsel %vm324_vm9, 1.0, %v756_v14 }
  0x9a   : > { %v405_v20 = vpop.permute.xlu0 %404 }
  0x9b   : > { %vm419_vm6 = vcmp.eq.s32.totalorder %v262_v12, %v405_v20 }
  0x9c   : > { %v627_v21 = vsel %vm419_vm6, 1.0, %v756_v14  ;;  %vm327_vm6 = vmand %vm314_vm2, %vm321_vm3 }
  0x9d   : > { %633 = vmatmul.msk.f32.gmra.mxu0 %vm340_vm4, %v627_v21  ;;  %635 = vmatmul.msk.f32.gmra.mxu2 %vm340_vm4, %v629_v23  ;;  %v619_v41 = vsel %vm327_vm6, 1.0, %v756_v14 }
  0xa5   : > { %636 = vmatmul.msk.f32.gmra.mxu2 %vm340_vm4, %v630_v25 }
  0xad   : > { %637 = vmatmul.msk.f32.gmra.mxu2 %vm340_vm4, %v631_v27 }
 0x10a   : > { %v296_v35 = vpop.f32.mrf.mxu0 }
 0x10b   : > { %v300_v36 = vmul.f32 %v299_v32, %v296_v35 }
 0x10d   : > { %374 = vmatpush.msra.mxu1 %v300_v36  ;;  %642 = vmatpush.msra.mxu3 %v300_v36 }
 0x10e   : > { %620 = vmatmul.msk.f32.vlgmr.msra.gmra.mxu1 %vm340_vm4, %v614_v37  ;;  %624 = vmatmul.msk.f32.vlgmr.msra.gmra.mxu3 %vm340_vm4, %v618_v38 }
 0x112   : > { %v472_v47 = vpop.f32.mrf.mxu0 }
 0x116   : > { %621 = vmatmul.msk.f32.gmra.mxu1 %vm340_vm4, %v615_v40  ;;  %625 = vmatmul.msk.f32.gmra.mxu3 %vm340_vm4, %v619_v41 }
 0x118   : > { %v478_v45 = vpop.f32.mrf.mxu2 }
 0x11a   : > { %v475_v53 = vpop.f32.mrf.mxu0 }
 0x11e   : > { %622 = vmatmul.msk.f32.gmra.mxu1 %vm340_vm4, %v616_v43 }
 0x120   : > { %v481_v46 = vpop.f32.mrf.mxu2 }
 0x126   : > { %623 = vmatmul.msk.f32.gmra.mxu1 %vm340_vm4, %v617_v44 }
 0x128   : > { %v484_v50 = vpop.f32.mrf.mxu2 }
 0x130   : > { %v487_v56 = vpop.f32.mrf.mxu2 }
 0x18b   : > { %v376_v48 = vpop.f32.mrf.mxu1 }
 0x18c   : > { %v490_v49 = vmul.f32 %v472_v47, %v376_v48 }
 0x18e   : > { %496 = vst [vmem:[%s244_s10] sm:$0xff] %v490_v49 }
 0x191   : > { %v388_v51 = vpop.f32.mrf.mxu3 }
 0x192   : > { %v494_v52 = vmul.f32 %v484_v50, %v388_v51 }
 0x193   : > { %v379_v54 = vpop.f32.mrf.mxu1 }
 0x194   : > { %v491_v55 = vmul.f32 %v475_v53, %v379_v54  ;;  %500 = vst [vmem:[%s244_s10 + $0x20] sm:$0xff] %v494_v52 }
 0x196   : > { %497 = vst [vmem:[%s244_s10 + $0x8] sm:$0xff] %v491_v55 }
 0x199   : > { %v391_v57 = vpop.f32.mrf.mxu3 }
 0x19a   : > { %v495_v58 = vmul.f32 %v487_v56, %v391_v57 }
 0x19b   : > { %v382_v59 = vpop.f32.mrf.mxu1 }
 0x19c   : > { %v492_v60 = vmul.f32 %v478_v45, %v382_v59  ;;  %501 = vst [vmem:[%s244_s10 + $0x28] sm:$0xff] %v495_v58 }
 0x19e   : > { %498 = vst [vmem:[%s244_s10 + $0x10] sm:$0xff] %v492_v60 }
 0x1a3   : > { %v385_v61 = vpop.f32.mrf.mxu1 }
 0x1a4   : > { %v493_v62 = vmul.f32 %v481_v46, %v385_v61 }
 0x1a6   : > { %499 = vst [vmem:[%s244_s10 + $0x18] sm:$0xff] %v493_v62 }
 0x1a7   : > { %718 = shalt.err (!%p715_p4)
}
 0x1a8   : > { %s757_s8 = smov 128   ;;  %s758_s9 = smov 8  }
 0x1a9   : > { %645 = dma.vmem_to_hbm [thread:$0]  (%p827_p5), %s516_s15, 768, %s518_s16, %s503_s17, %s757_s8, %s757_s8, %s758_s9  }
 0x1aa PF: > { %p651_p7 = scmp.ge.s32.totalorder %s753_s21, 2  ;;  %s532_s10 = sand.u32 1, %s741_s18  }
 0x1ab   : > { %s533_s11 = scalar_lea.sflag [#allocation3], %s532_s10 }
 0x1ac   : > { %p648_p8 = pnand %p651_p7, %p831_p6 }
 0x1ae   : > { %p649_p9 = pneg %p648_p8 }
 0x1b0   : > { %736 = dma.done.wait (%p649_p9), %s533_s11, 768  }
 0x1b1   : > { %738 = vsyncadd (%p649_p9), %s533_s11, 4294966528  ;;  %p15_p10 = scmp.ge.s32.totalorder %s814_s24, 4   ;;  %s934_s18 = smov %s745_s19 }
 0x1b2   : > { %s935_s19 = smov %s749_s20  ;;  %s936_s20 = smov %s825_s27 }
 0x1b3   : > { %s937_s21 = smov %s814_s24  ;;  %17 = sbr.rel (!%p15_p10) target bundleno = 3 (0x3), region = 81 }
 0x1b8   :  { %539 = vsyncpa [#allocation3], 1 }
 0x1b9   :  { %541 = vsyncpa [#allocation3 + $0x1], 1 }

</bundles_post_ra>
